<compile_context>
chip_gen: v7x
topology: tpu7x:2x2x1
jax: 0.10.0
libtpu: 0.0.40
codegen_flags: <defaults>
</compile_context>

<pallas_src>
import jax
import jax.numpy as jnp
from jax.experimental import pallas as pl
from jax.experimental.pallas import tpu as pltpu


def _round_up(x, m):
    return (x + m - 1) // m * m


def _tile_plan(n, tm_target=512, tk_target=1024):
    """Pick (n_p, tm, tk): 128-multiples that divide n_p, biased large (HBM-bound)."""
    n_p = _round_up(n, 128)

    def pick(target):
        t = max(128, min(target, n_p))
        t = (t // 128) * 128
        while n_p % t != 0:
            t -= 128
        return t

    tk = pick(tk_target)
    tm = pick(tm_target)
    # v7x has 2 TensorCores engaged only via the parallel grid axis: make sure
    # the row-block axis has >= 2 blocks whenever the graph is big enough.
    if n_p // tm < 2 and n_p >= 256:
        tm = pick(n_p // 2)
    return n_p, tm, tk


def prepare_graph(a_binary, n_p, adj_dtype=jnp.bfloat16):
    """One-time graph preprocessing (reused across training steps).

    a_binary: (N, N) 0/1 adjacency with A[dst, src] = 1 (self-loops optional).
    Returns (padded adjacency in adj_dtype, padded f32 1/in_degree column).
    On v7x pass adj_dtype=jnp.float8_e4m3fn to halve the dominant HBM stream
    (0/1 are exact in fp8; the 1/deg scale stays f32).
    """
    n = a_binary.shape[0]
    deg = jnp.sum(a_binary.astype(jnp.float32), axis=1)          # in-degree
    inv_deg = jnp.where(deg > 0.0, 1.0 / jnp.clip(deg, 1.0, None), 0.0)
    a_p = jnp.zeros((n_p, n_p), adj_dtype).at[:n, :n].set(
        a_binary.astype(adj_dtype))
    inv_deg_p = jnp.zeros((n_p, 1), jnp.float32).at[:n, 0].set(inv_deg)
    return a_p, inv_deg_p


def gcn_layer1_kernel(a_ref, h_ref, invdeg_ref, w_ref, b_ref, out_ref, acc_ref):
    """grid = (row-block i [parallel], k-block over source nodes [arbitrary])."""
    k = pl.program_id(1)

    @pl.when(k == 0)
    def _():
        acc_ref[...] = jnp.zeros_like(acc_ref)

    # Neighbor-sum in the *input* feature space (reordered matmul):
    # (tm, tk) bf16 @ (tk, d_in) bf16 -> f32 accumulate on the MXU.
    acc_ref[...] += jnp.dot(a_ref[...], h_ref[...],
                            preferred_element_type=jnp.float32)

    # Epilogue once per output row-block: exact f32 mean normalization,
    # tiny linear, bias (masked for zero-degree rows) and ReLU.
    @pl.when(k == pl.num_programs(1) - 1)
    def _():
        inv_deg = invdeg_ref[...]                                  # (tm, 1) f32
        h_agg = acc_ref[...] * inv_deg                             # exact mean
        bias = jnp.where(inv_deg > 0.0, 1.0, 0.0) * b_ref[...]     # DGL: deg==0 -> 0
        h_lin = jnp.dot(h_agg, w_ref[...],
                        preferred_element_type=jnp.float32) + bias
        out_ref[...] = jnp.maximum(h_lin, 0.0).astype(out_ref.dtype)


def gcn_layer1(a_pad, inv_deg_pad, h, w, b, *, tm, tk, out_dtype=jnp.float32):
    """a_pad: (n_p, n_p) binary adjacency (bf16/fp8, padded, from prepare_graph),
    inv_deg_pad: (n_p, 1) f32, h: (N, D_in) f32, w: (D_in, D_out), b: (D_out,)."""
    n_p = a_pad.shape[0]
    n, d_in = h.shape
    d_out = w.shape[1]
    d_out_p = _round_up(d_out, 128)          # lane-dense (unmasked) stores

    # Per-call, cheap padding: only O(N*D_in) / O(D_in*D_out) arrays.
    # D_in is intentionally NOT padded (full-array last dim is legal).
    h_p = jnp.zeros((n_p, d_in), jnp.bfloat16).at[:n, :].set(
        h.astype(jnp.bfloat16))
    w_p = jnp.zeros((d_in, d_out_p), jnp.float32).at[:, :d_out].set(
        w.astype(jnp.float32))
    b_p = jnp.zeros((1, d_out_p), jnp.float32).at[0, :d_out].set(
        b.astype(jnp.float32))

    grid = (n_p // tm, n_p // tk)

    cost = pl.CostEstimate(
        flops=2 * n_p * n_p * d_in + 2 * n_p * d_in * d_out_p,
        transcendentals=0,
        bytes_accessed=(
            a_pad.size * a_pad.dtype.itemsize                 # A streamed once
            + (n_p // tm) * n_p * d_in * 2                    # h re-streamed per row block
            + n_p * 4                                         # 1/deg
            + d_in * d_out_p * 4 + d_out_p * 4                # W, bias (resident)
            + n_p * d_out_p * jnp.dtype(out_dtype).itemsize   # output
        ),
    )

    out_p = pl.pallas_call(
        gcn_layer1_kernel,
        out_shape=jax.ShapeDtypeStruct((n_p, d_out_p), out_dtype),
        grid_spec=pltpu.PrefetchScalarGridSpec(
            num_scalar_prefetch=0,
            grid=grid,
            in_specs=[
                pl.BlockSpec((tm, tk), lambda i, k: (i, k)),         # A tile
                pl.BlockSpec((tk, d_in), lambda i, k: (k, 0)),       # h tile (true D_in)
                pl.BlockSpec((tm, 1), lambda i, k: (i, 0)),          # 1/deg per row
                pl.BlockSpec((d_in, d_out_p), lambda i, k: (0, 0)),  # W resident
                pl.BlockSpec((1, d_out_p), lambda i, k: (0, 0)),     # bias resident
            ],
            out_specs=pl.BlockSpec((tm, d_out_p), lambda i, k: (i, 0)),
            scratch_shapes=[pltpu.VMEM((tm, d_in), jnp.float32)],
        ),
        compiler_params=pltpu.CompilerParams(
            dimension_semantics=("parallel", "arbitrary"),
        ),
        cost_estimate=cost,
    )(a_pad, h_p, inv_deg_pad, w_p, b_p)

    return out_p[:n, :d_out]


def build_binary_adjacency(n):
    """Deterministic small graph: ring edges + self-loops, 0/1, A[dst, src] = 1."""
    src = jnp.arange(n)
    dst_ring = (jnp.arange(n) + 1) % n                 # edge i -> i+1
    a = jnp.zeros((n, n), jnp.float32)
    a = a.at[dst_ring, src].set(1.0)
    a = a.at[jnp.arange(n), jnp.arange(n)].set(1.0)    # self-loops
    return a


if __name__ == "__main__":
    N, D_IN, D_OUT = 256, 8, 32

    key = jax.random.PRNGKey(0)
    k_h, k_w, k_b = jax.random.split(key, 3)

    # node features
    h = jax.random.normal(k_h, (N, D_IN), dtype=jnp.float32)

    # torch.nn.Linear-style init: U(-1/sqrt(fan_in), 1/sqrt(fan_in))
    bound = 1.0 / jnp.sqrt(jnp.float32(D_IN))
    w = jax.random.uniform(k_w, (D_IN, D_OUT), jnp.float32, -bound, bound)
    b = jax.random.uniform(k_b, (D_OUT,), jnp.float32, -bound, bound)

    a_bin = build_binary_adjacency(N)

    # Small tiles here so the test exercises a multi-block grid (2 x 2) and the
    # k-accumulation path; production defaults are tm=512, tk=1024.
    n_p, tm, tk = _tile_plan(N, tm_target=128, tk_target=128)

    # One-time graph preprocessing (reused across training steps).
    a_pad, inv_deg_pad = prepare_graph(a_bin, n_p)

    out = gcn_layer1(a_pad, inv_deg_pad, h, w, b, tm=tm, tk=tk)
    jax.block_until_ready(out)

    # pure-JAX reference in the ORIGINAL op order / f32 (bf16 h into the
    # adjacency matmul introduces a small, bounded error).
    deg = jnp.clip(jnp.sum(a_bin, axis=1, keepdims=True), 1.0, None)
    a_norm = a_bin / deg
    ref = jnp.maximum(a_norm @ (h @ w + b[None, :]), 0.0)

    assert out.shape == (N, D_OUT)
    err = jnp.max(jnp.abs(out - ref))
    assert jnp.allclose(out, ref, atol=5e-2, rtol=5e-2), f"max abs err {err}"

    print("KERNEL_OK")
</pallas_src>

<mosaic_0001>
module attributes {stable_mosaic.version = 11 : i64} {
  func.func @gcn_layer1_kernel(%arg0: i32, %arg1: i32, %arg2: memref<128x128xbf16, #tpu.memory_space<vmem>>, %arg3: memref<128x8xbf16, #tpu.memory_space<vmem>>, %arg4: memref<128x1xf32, #tpu.memory_space<vmem>>, %arg5: memref<8x128xf32, #tpu.memory_space<vmem>>, %arg6: memref<1x128xf32, #tpu.memory_space<vmem>>, %arg7: memref<128x128xf32, #tpu.memory_space<vmem>>, %arg8: memref<128x8xf32, #tpu.memory_space<vmem>>) attributes {dimension_semantics = [#tpu.dimension_semantics<parallel>, #tpu.dimension_semantics<arbitrary>], iteration_bounds = array<i64: 2, 2>, scalar_prefetch = 0 : i64, scratch_operands = 1 : i64, tpu.core_type = #tpu.core_type<tc>, window_params = [{transform_indices = @transform_0, window_bounds = array<i64: 128, 128>}, {transform_indices = @transform_1, window_bounds = array<i64: 128, 8>}, {transform_indices = @transform_2, window_bounds = array<i64: 128, 1>}, {pipeline_mode = #tpu.pipeline_mode<synchronous>, transform_indices = @transform_3, window_bounds = array<i64: 8, 128>}, {pipeline_mode = #tpu.pipeline_mode<synchronous>, transform_indices = @transform_4, window_bounds = array<i64: 1, 128>}, {transform_indices = @transform_5, window_bounds = array<i64: 128, 128>}]} {
    %c0_i32 = arith.constant 0 : i32
    %0 = arith.cmpi eq, %arg1, %c0_i32 : i32
    %1 = arith.extui %0 : i1 to i32
    %c0_i32_0 = arith.constant 0 : i32
    %2 = arith.cmpi ne, %1, %c0_i32_0 : i32
    scf.if %2 {
      %cst_9 = arith.constant 0.000000e+00 : f32
      %12 = vector.broadcast %cst_9 : f32 to vector<128x8xf32>
      %c0_10 = arith.constant 0 : index
      %c0_11 = arith.constant 0 : index
      %13 = vector.load %arg8[%c0_10, %c0_11] : memref<128x8xf32, #tpu.memory_space<vmem>>, vector<128x8xf32>
      tpu.vector_store %arg8[%c0_10, %c0_11], %12 {strides = array<i32>} : memref<128x8xf32, #tpu.memory_space<vmem>>, vector<128x8xf32>,
    } else {
    }
    %c0 = arith.constant 0 : index
    %c0_1 = arith.constant 0 : index
    %3 = vector.load %arg8[%c0, %c0_1] : memref<128x8xf32, #tpu.memory_space<vmem>>, vector<128x8xf32>
    %c0_2 = arith.constant 0 : index
    %c0_3 = arith.constant 0 : index
    %4 = vector.load %arg2[%c0_2, %c0_3] : memref<128x128xbf16, #tpu.memory_space<vmem>>, vector<128x128xbf16>
    %c0_4 = arith.constant 0 : index
    %c0_5 = arith.constant 0 : index
    %5 = vector.load %arg3[%c0_4, %c0_5] : memref<128x8xbf16, #tpu.memory_space<vmem>>, vector<128x8xbf16>
    %cst = arith.constant dense<0.000000e+00> : vector<128x8xf32>
    %6 = tpu.matmul %4, %5, %cst {dimension_numbers = #tpu.dot_dimension_numbers<[1], [0], [0], [1], [0, 0, 1, 1], [], []>} : vector<128x128xbf16>, vector<128x8xbf16>, vector<128x8xf32> -> vector<128x8xf32>
    %7 = arith.addf %3, %6 : vector<128x8xf32>
    %c0_6 = arith.constant 0 : index
    %c0_7 = arith.constant 0 : index
    %8 = vector.load %arg8[%c0_6, %c0_7] : memref<128x8xf32, #tpu.memory_space<vmem>>, vector<128x8xf32>
    tpu.vector_store %arg8[%c0_6, %c0_7], %7 {strides = array<i32>} : memref<128x8xf32, #tpu.memory_space<vmem>>, vector<128x8xf32>,
    %c1_i32 = arith.constant 1 : i32
    %9 = arith.cmpi eq, %arg1, %c1_i32 : i32
    %10 = arith.extui %9 : i1 to i32
    %c0_i32_8 = arith.constant 0 : i32
    %11 = arith.cmpi ne, %10, %c0_i32_8 : i32
    scf.if %11 {
      %c0_9 = arith.constant 0 : index
      %c0_10 = arith.constant 0 : index
      %12 = vector.load %arg4[%c0_9, %c0_10] : memref<128x1xf32, #tpu.memory_space<vmem>>, vector<128x1xf32>
      %c0_11 = arith.constant 0 : index
      %c0_12 = arith.constant 0 : index
      %13 = vector.load %arg8[%c0_11, %c0_12] : memref<128x8xf32, #tpu.memory_space<vmem>>, vector<128x8xf32>
      %14 = vector.broadcast %12 : vector<128x1xf32> to vector<128x8xf32>
      %15 = arith.mulf %13, %14 : vector<128x8xf32>
      %cst_13 = arith.constant 0.000000e+00 : f32
      %16 = vector.broadcast %cst_13 : f32 to vector<128x1xf32>
      %17 = arith.cmpf ogt, %12, %16 : vector<128x1xf32>
      %cst_14 = arith.constant 1.000000e+00 : f32
      %cst_15 = arith.constant 0.000000e+00 : f32
      %18 = vector.broadcast %cst_14 : f32 to vector<128x1xf32>
      %19 = vector.broadcast %cst_15 : f32 to vector<128x1xf32>
      %20 = arith.select %17, %18, %19 : vector<128x1xi1>, vector<128x1xf32>
      %c0_16 = arith.constant 0 : index
      %c0_17 = arith.constant 0 : index
      %21 = vector.load %arg6[%c0_16, %c0_17] : memref<1x128xf32, #tpu.memory_space<vmem>>, vector<1x128xf32>
      %22 = vector.broadcast %20 : vector<128x1xf32> to vector<128x128xf32>
      %23 = vector.broadcast %21 : vector<1x128xf32> to vector<128x128xf32>
      %24 = arith.mulf %22, %23 : vector<128x128xf32>
      %c0_18 = arith.constant 0 : index
      %c0_19 = arith.constant 0 : index
      %25 = vector.load %arg5[%c0_18, %c0_19] : memref<8x128xf32, #tpu.memory_space<vmem>>, vector<8x128xf32>
      %cst_20 = arith.constant dense<0.000000e+00> : vector<128x128xf32>
      %26 = tpu.matmul %15, %25, %cst_20 {dimension_numbers = #tpu.dot_dimension_numbers<[1], [0], [0], [1], [0, 0, 1, 1], [], []>} : vector<128x8xf32>, vector<8x128xf32>, vector<128x128xf32> -> vector<128x128xf32>
      %27 = arith.addf %26, %24 : vector<128x128xf32>
      %cst_21 = arith.constant 0.000000e+00 : f32
      %28 = vector.broadcast %cst_21 : f32 to vector<128x128xf32>
      %29 = arith.maximumf %27, %28 : vector<128x128xf32>
      %c0_22 = arith.constant 0 : index
      %c0_23 = arith.constant 0 : index
      %30 = vector.load %arg7[%c0_22, %c0_23] : memref<128x128xf32, #tpu.memory_space<vmem>>, vector<128x128xf32>
      tpu.vector_store %arg7[%c0_22, %c0_23], %29 {strides = array<i32>} : memref<128x128xf32, #tpu.memory_space<vmem>>, vector<128x128xf32>,
    } else {
    }
    return
  }
  func.func @transform_0(%arg0: i32, %arg1: i32) -> (i32, i32) {
    %c0_i32 = arith.constant 0 : i32
    return %arg0, %arg1 : i32, i32
  }
  func.func @transform_1(%arg0: i32, %arg1: i32) -> (i32, i32) {
    %c0_i32 = arith.constant 0 : i32
    %c0_i32_0 = arith.constant 0 : i32
    return %arg1, %c0_i32 : i32, i32
  }
  func.func @transform_2(%arg0: i32, %arg1: i32) -> (i32, i32) {
    %c0_i32 = arith.constant 0 : i32
    %c0_i32_0 = arith.constant 0 : i32
    return %arg0, %c0_i32 : i32, i32
  }
  func.func @transform_3(%arg0: i32, %arg1: i32) -> (i32, i32) {
    %c0_i32 = arith.constant 0 : i32
    %c0_i32_0 = arith.constant 0 : i32
    %c0_i32_1 = arith.constant 0 : i32
    return %c0_i32, %c0_i32_0 : i32, i32
  }
  func.func @transform_4(%arg0: i32, %arg1: i32) -> (i32, i32) {
    %c0_i32 = arith.constant 0 : i32
    %c0_i32_0 = arith.constant 0 : i32
    %c0_i32_1 = arith.constant 0 : i32
    return %c0_i32, %c0_i32_0 : i32, i32
  }
  func.func @transform_5(%arg0: i32, %arg1: i32) -> (i32, i32) {
    %c0_i32 = arith.constant 0 : i32
    %c0_i32_0 = arith.constant 0 : i32
    return %arg0, %c0_i32 : i32, i32
  }
}

</mosaic_0001>

<bundles_post_ra>
// kernel: tpu_custom_call.1
= control target key start
LH: loop header
LB: loop body
LE: loop exit
PB: predicated region body
PF: predicated region fallthrough
CT: control target
= control target key end

     0   :  { %s2097_s0 = inlined_call_operand.vmem [shape: bf16[256,256], index: 0, kind: input, shape index: {}]   ;;  %s2098_s1 = inlined_call_operand.vmem [shape: bf16[256,8], index: 1, kind: input, shape index: {}]   ;;  %s2099_s2 = inlined_call_operand.vmem [shape: f32[256,1], index: 2, kind: input, shape index: {}]   ;;  %s2100_s3 = inlined_call_operand.vmem [shape: f32[8,128], index: 3, kind: input, shape index: {}]   ;;  %s2101_s4 = inlined_call_operand.vmem [shape: f32[1,128], index: 4, kind: input, shape index: {}]   ;;  %s2102_s5 = inlined_call_operand.hbm [shape: f32[256,128], index: 5, kind: output, shape index: {}]  }
   0x1   :  { %2107 = sst [smem:[#allocation10_spill]] %s2097_s0 }
   0x2   :  { %10 = vsyncpa [#allocation5], 0 }
   0x3   :  { %12 = vsyncpa [#allocation5 + $0x1], 0  ;;  %s1759_s18 = smov 0   ;;  %s1761_s19 = smov 0  }
   0x4   :  { %s1763_s20 = smov 0   ;;  %s1765_s21 = smov 0  }
   0x5   :  { %s1767_s22 = smov 0   ;;  %s1769_s23 = smov 0  }
   0x6   :  { %s1771_s24 = smov 0   ;;  %s1773_s25 = smov 0  }
   0x7   :  { %s1775_s26 = smov 0   ;;  %s1777_s27 = smov 0  }
   0x8 LB: > { %2108 = sst [smem:[#allocation7_spill]] %s1717_s26  ;;  %s1295_s28 = sadd.s32 4294967295, %s1721_s27   ;;  %s1721_s27 = sphi %s1777_s27, %s18_s27   ;;  %s1717_s26 = sphi %s1775_s26, %s2118_s26   ;;  %s1713_s25 = sphi %s1773_s25, %s2125_s25   ;;  %s1709_s24 = sphi %s1771_s24, %s2116_s24   ;;  %s1705_s23 = sphi %s1769_s23, %s2124_s23   ;;  %s1701_s22 = sphi %s1767_s22, %s2123_s22   ;;  %s1697_s21 = sphi %s1765_s21, %s2122_s21   ;;  %s1693_s20 = sphi %s1763_s20, %s2121_s20   ;;  %s1689_s19 = sphi %s1761_s19, %s2120_s19   ;;  %s1685_s18 = sphi %s1759_s18, %s2119_s18  }
   0x9   : > { %s1296_s29 = sadd.s32 4294967294, %s1721_s27   ;;  %s27_s30 = sadd.s32 1, %s1713_s25 }
   0xa   : > { %s30_s6 = sadd.s32 1, %s1717_s26  ;;  %p28_p0 = scmp.ge.s32.totalorder %s27_s30, 2 }
   0xb   : > { %s39_s7 = sadd.s32 1, %s1701_s22  ;;  %p46_p1 = scmp.ne.s32.totalorder %s1701_s22, %s1697_s21 }
   0xc   : > { %p47_p2 = scmp.eq.s32.totalorder %s1721_s27, 0  ;;  %s2127_s30 = smov (%p28_p0, %s27_s30), 0 }
   0xd   : > { %2109 = sst [smem:[#allocation8_spill]] %s2127_s30  ;;  %s2129_s6 = smov (!%p28_p0, %s30_s6), %s1717_s26 }
   0xe   : > { %s35_s8 = ssub.s32 %s1713_s25, %s2127_s30  ;;  %p1822_p3 = por %p47_p2, %p46_p1 }
   0xf   : > { %p32_p4 = scmp.ge.s32.totalorder %s2129_s6, 2  ;;  %s159_s10 = sadd.s32 1, %s1693_s20 }
  0x10   : > { %p169_p5 = scmp.ne.s32.totalorder %s1693_s20, %s1689_s19  ;;  %p170_p6 = scmp.eq.s32.totalorder %s1295_s28, 3 }
  0x11   : > { %s2131_s6 = smov (%p32_p4, %s2129_s6), 0  ;;  %p175_p8 = scmp.ne.s32.totalorder %s1689_s19, %s1685_s18 }
  0x12   : > { %2111 = sst [smem:[#allocation9_spill]] %s2131_s6  ;;  %p1831_p7 = por %p170_p6, %p169_p5 }
  0x13   : > { %s34_s12 = ssub.s32 %s1717_s26, %s2131_s6  ;;  %p176_p9 = scmp.eq.s32.totalorder %s1296_s29, 3 }
  0x14   : > { %s36_s13 = sor.u32 %s35_s8, %s34_s12  ;;  %p157_p10 = scmp.eq.s32.totalorder %s34_s12, 0 }
  0x15   : > { %p37_p11 = scmp.eq.s32.totalorder %s36_s13, 0  ;;  %p1839_p12 = por %p176_p9, %p175_p8 }
  0x16   : > { %s1844_s15 = scalar_select %p157_p10, %s1693_s20, %s159_s10  }
  0x17   : > { %s1847_s16 = scalar_select %p37_p11, %s1701_s22, %s39_s7  }
  0x18   : > { %p1298_p13 = scmp.ge.s32.totalorder %s1721_s27, 4 }
  0x1a   : > { %198 = sbr.rel (%p1298_p13) target bundleno = 53 (0x35), region = 24 }
  0x21   : > { %201 = sbr.rel (!%p1822_p3) target bundleno = 53 (0x35), region = 28  ;;  %s203_s17 = sand.u32 (%p1822_p3), 1, %s1701_s22  }
  0x22   : > { %s1350_s28 = sshll.u32 (%p1822_p3), %s1717_s26, 5  ;;  %s1299_s29 = sshll.u32 (%p1822_p3), %s203_s17, 6 }
  0x23   : > { %s208_s8 = sadd.s32 (%p1822_p3), %s1713_s25, %s1350_s28  ;;  %s2114_s0 = sld [smem:[#allocation10_spill]] (%p1822_p3) }
  0x24   : > { %s1302_s12 = sshll.u32 (%p1822_p3), %s208_s8, 2  ;;  %s205_s7 = scalar_lea.vmem (%p1822_p3), [#allocation3], %s1299_s29 }
  0x29   : > { %s1858_s10 = scalar_lea.vmem %s2114_s0, %s1302_s12 }
  0x2a   : > { %v226_v0 = vld [vmem:[%s1858_s10] sm:$0xf]  ;;  %v228_v1 = vld [vmem:[%s1858_s10 + $0x8] sm:$0xf]  ;;  %v230_v2 = vld [vmem:[%s1858_s10 + $0x10] sm:$0xf] }
  0x2b   : > { %227 = vst [vmem:[%s205_s7] sm:$0xf] %v226_v0  ;;  %229 = vst [vmem:[%s205_s7 + $0x4] sm:$0xf] %v228_v1  ;;  %v232_v3 = vld [vmem:[%s1858_s10 + $0x18] sm:$0xf] }
  0x2c   : > { %231 = vst [vmem:[%s205_s7 + $0x8] sm:$0xf] %v230_v2  ;;  %v234_v4 = vld [vmem:[%s1858_s10 + $0x20] sm:$0xf]  ;;  %v236_v5 = vld [vmem:[%s1858_s10 + $0x28] sm:$0xf] }
  0x2d   : > { %233 = vst [vmem:[%s205_s7 + $0xc] sm:$0xf] %v232_v3  ;;  %235 = vst [vmem:[%s205_s7 + $0x10] sm:$0xf] %v234_v4  ;;  %v238_v6 = vld [vmem:[%s1858_s10 + $0x30] sm:$0xf] }
  0x2e   : > { %237 = vst [vmem:[%s205_s7 + $0x14] sm:$0xf] %v236_v5  ;;  %v240_v7 = vld [vmem:[%s1858_s10 + $0x38] sm:$0xf]  ;;  %v242_v8 = vld [vmem:[%s1858_s10 + $0x40] sm:$0xf] }
  0x2f   : > { %239 = vst [vmem:[%s205_s7 + $0x18] sm:$0xf] %v238_v6  ;;  %241 = vst [vmem:[%s205_s7 + $0x1c] sm:$0xf] %v240_v7  ;;  %v244_v9 = vld [vmem:[%s1858_s10 + $0x48] sm:$0xf] }
  0x30   : > { %243 = vst [vmem:[%s205_s7 + $0x20] sm:$0xf] %v242_v8  ;;  %v246_v10 = vld [vmem:[%s1858_s10 + $0x50] sm:$0xf]  ;;  %v248_v11 = vld [vmem:[%s1858_s10 + $0x58] sm:$0xf] }
  0x31   : > { %245 = vst [vmem:[%s205_s7 + $0x24] sm:$0xf] %v244_v9  ;;  %247 = vst [vmem:[%s205_s7 + $0x28] sm:$0xf] %v246_v10  ;;  %v250_v12 = vld [vmem:[%s1858_s10 + $0x60] sm:$0xf] }
  0x32   : > { %249 = vst [vmem:[%s205_s7 + $0x2c] sm:$0xf] %v248_v11  ;;  %v252_v13 = vld [vmem:[%s1858_s10 + $0x68] sm:$0xf]  ;;  %v254_v14 = vld [vmem:[%s1858_s10 + $0x70] sm:$0xf] }
  0x33   : > { %251 = vst [vmem:[%s205_s7 + $0x30] sm:$0xf] %v250_v12  ;;  %253 = vst [vmem:[%s205_s7 + $0x34] sm:$0xf] %v252_v13  ;;  %v256_v15 = vld [vmem:[%s1858_s10 + $0x78] sm:$0xf] }
  0x34   : > { %255 = vst [vmem:[%s205_s7 + $0x38] sm:$0xf] %v254_v14  ;;  %257 = vst [vmem:[%s205_s7 + $0x3c] sm:$0xf] %v256_v15 }
  0x35 PF: > { %p1303_p0 = scmp.ge.s32.totalorder %s1721_s27, 1  ;;  %p329_p1 = scmp.lt.s32.totalorder %s1721_s27, 5 }
  0x37   : > { %p330_p2 = pnand %p1303_p0, %p329_p1 }
  0x38   : > { %s336_s6 = sand.u32 (!%p330_p2), 1, %s1697_s21   ;;  %s2106_s9 = sand.u32 (!%p330_p2), 1, %s1689_s19  }
  0x39   : > { %333 = sbr.rel (%p330_p2) target bundleno = 697 (0x2b9), region = 77  ;;  %s1304_s17 = sshll.u32 (!%p330_p2), %s336_s6, 6 }
  0x3a   : > { %s1305_s28 = sshll.u32 (!%p330_p2), %s2106_s9, 7  ;;  %s1306_s29 = sshll.u32 (!%p330_p2), %s1705_s23, 4 }
  0x3b   : > { %s1308_s8 = sshll.u32 (!%p330_p2), %s1709_s24, 4  ;;  %p375_p3 = scmp.lt.s32.totalorder (!%p330_p2), %s1306_s29, 31 }
  0x3c   : > { %p381_p4 = scmp.lt.s32.totalorder (!%p330_p2), %s1308_s8, 31  ;;  %s1894_s6 = scalar_lea.vmem (!%p330_p2), [#allocation3], %s1304_s17 }
  0x3d   : > { %s1896_s9 = scalar_lea.vmem (!%p330_p2), [#allocation4], %s1305_s28  ;;  %p1310_p5 = scmp.ne.s32.totalorder (!%p330_p2), %s1705_s23, 0 }
  0x40   : > { %s2133_s29 = smov (!%p375_p3, %s1306_s29), 31  ;;  %s2135_s8 = smov (!%p381_p4, %s1308_s8), 31 }
  0x41   : > { %s1307_s12 = sshll.u32 %s2133_s29, 2  ;;  %s1309_s0 = sshll.u32 %s2135_s8, 3  ;;  %vm392_vm0 = vcmask (!%p1310_p5), 64512   ;;  %v1723_v16 = vmov (!%p1310_p5), 0.0  }
  0x42   : > { %s1887_s7 = scalar_lea.vmem %s2098_s1, %s1307_s12  ;;  %s1892_s21 = scalar_lea.vmem %s2099_s2, %s1309_s0  ;;  %393 = vst.msk [vmem:[#allocation2] sm:$0xff] (!%p1310_p5), %vm392_vm0, %v1723_v16  ;;  %394 = vst.msk [vmem:[#allocation2 + $0x8] sm:$0xff] (!%p1310_p5), %vm392_vm0, %v1723_v16 }
  0x43   : > { %391 = sbr.rel (%p1310_p5) target bundleno = 74 (0x4a), region = 85  ;;  %395 = vst.msk [vmem:[#allocation2 + $0x10] sm:$0xff] (!%p1310_p5), %vm392_vm0, %v1723_v16  ;;  %396 = vst.msk [vmem:[#allocation2 + $0x18] sm:$0xff] (!%p1310_p5), %vm392_vm0, %v1723_v16 }
  0x44   : > { %397 = vst.msk [vmem:[#allocation2 + $0x20] sm:$0xff] (!%p1310_p5), %vm392_vm0, %v1723_v16  ;;  %398 = vst.msk [vmem:[#allocation2 + $0x28] sm:$0xff] (!%p1310_p5), %vm392_vm0, %v1723_v16 }
  0x45   : > { %399 = vst.msk [vmem:[#allocation2 + $0x30] sm:$0xff] (!%p1310_p5), %vm392_vm0, %v1723_v16  ;;  %400 = vst.msk [vmem:[#allocation2 + $0x38] sm:$0xff] (!%p1310_p5), %vm392_vm0, %v1723_v16 }
  0x46   : > { %401 = vst.msk [vmem:[#allocation2 + $0x40] sm:$0xff] (!%p1310_p5), %vm392_vm0, %v1723_v16  ;;  %402 = vst.msk [vmem:[#allocation2 + $0x48] sm:$0xff] (!%p1310_p5), %vm392_vm0, %v1723_v16 }
  0x47   : > { %403 = vst.msk [vmem:[#allocation2 + $0x50] sm:$0xff] (!%p1310_p5), %vm392_vm0, %v1723_v16  ;;  %404 = vst.msk [vmem:[#allocation2 + $0x58] sm:$0xff] (!%p1310_p5), %vm392_vm0, %v1723_v16 }
  0x48   : > { %405 = vst.msk [vmem:[#allocation2 + $0x60] sm:$0xff] (!%p1310_p5), %vm392_vm0, %v1723_v16  ;;  %406 = vst.msk [vmem:[#allocation2 + $0x68] sm:$0xff] (!%p1310_p5), %vm392_vm0, %v1723_v16 }
  0x49   : > { %407 = vst.msk [vmem:[#allocation2 + $0x70] sm:$0xff] (!%p1310_p5), %vm392_vm0, %v1723_v16  ;;  %408 = vst.msk [vmem:[#allocation2 + $0x78] sm:$0xff] (!%p1310_p5), %vm392_vm0, %v1723_v16 }
  0x4a PF: > { %v1553_v17 = vld [vmem:[%s1887_s7] sm:$0xff]   ;;  %v1554_v18 = vld [vmem:[%s1887_s7 + $0x8] sm:$0xff]   ;;  %v1555_v19 = vld [vmem:[%s1887_s7 + $0x10] sm:$0xff]   ;;  %vm666_vm1 = vcmask 64512   ;;  %p1327_p6 = scmp.ne.s32.totalorder %s1705_s23, 1 }
  0x4b   : > { %1385 = vmatprep.subr.bf16.mxu0 %v1553_v17  ;;  %1443 = vmatprep.subr.bf16.mxu1 %v1553_v17  ;;  %v1556_v20 = vld [vmem:[%s1887_s7 + $0x18] sm:$0xff]   ;;  %v1561_v21 = vld [vmem:[%s1894_s6] sm:$0xff]   ;;  %v1558_v24 = vld [vmem:[%s1887_s7 + $0x28] sm:$0xff]  }
  0x4c   : > { %1386 = vmatpush3.bf16.msra.mxu0 %v1553_v17  ;;  %1451 = vmatpush3.bf16.msra.mxu1 %v1553_v17  ;;  %v1562_v22 = vld [vmem:[%s1894_s6 + $0x20] sm:$0xff]   ;;  %v1559_v25 = vld [vmem:[%s1887_s7 + $0x30] sm:$0xff]   ;;  %v1560_v26 = vld [vmem:[%s1887_s7 + $0x38] sm:$0xff]  }
  0x4d   : > { %1387 = vmatprep.subr.bf16.mxu0 %v1554_v18  ;;  %1444 = vmatprep.subr.bf16.mxu1 %v1554_v18  ;;  %v1557_v23 = vld [vmem:[%s1887_s7 + $0x20] sm:$0xff]   ;;  %v1563_v27 = vld [vmem:[%s1894_s6 + $0x8] sm:$0xff]   ;;  %v1565_v29 = vld [vmem:[%s1894_s6 + $0x10] sm:$0xff]  }
  0x4e   : > { %1401 = vmatprep.mubr.bf16.mxu0 %v1561_v21  ;;  %1409 = vmatprep.mubr.bf16.mxu1 %v1562_v22  ;;  %v1564_v28 = vld [vmem:[%s1894_s6 + $0x28] sm:$0xff]   ;;  %v1566_v30 = vld [vmem:[%s1894_s6 + $0x30] sm:$0xff]   ;;  %v1567_v31 = vld [vmem:[%s1894_s6 + $0x18] sm:$0xff]  }
  0x4f   : > { %v1568_v32 = vld [vmem:[%s1894_s6 + $0x38] sm:$0xff]   ;;  %v411_v33 = vld [vmem:[#allocation2 + $0x10] sm:$0xff]  ;;  %v409_v35 = vld [vmem:[#allocation2] sm:$0xff] }
  0x50   : > { %1388 = vmatpush3.bf16.msra.mxu0 %v1554_v18  ;;  %1452 = vmatpush3.bf16.msra.mxu1 %v1554_v18  ;;  %v419_v34 = vld [vmem:[#allocation2 + $0x50] sm:$0xff]  ;;  %v417_v36 = vld [vmem:[#allocation2 + $0x40] sm:$0xff]  ;;  %v412_v39 = vld [vmem:[#allocation2 + $0x18] sm:$0xff] }
  0x51   : > { %1389 = vmatprep.subr.bf16.mxu0 %v1555_v19  ;;  %1445 = vmatprep.subr.bf16.mxu1 %v1555_v19  ;;  %v420_v40 = vld [vmem:[#allocation2 + $0x58] sm:$0xff]  ;;  %v410_v45 = vld [vmem:[#allocation2 + $0x8] sm:$0xff]  ;;  %v415_v57 = vld [vmem:[#allocation2 + $0x30] sm:$0xff] }
  0x52   : > { %v418_v46 = vld [vmem:[#allocation2 + $0x48] sm:$0xff]  ;;  %v423_v58 = vld [vmem:[#allocation2 + $0x70] sm:$0xff]  ;;  %v413_v59 = vld [vmem:[#allocation2 + $0x20] sm:$0xff] }
  0x53   : > { %v421_v60 = vld [vmem:[#allocation2 + $0x60] sm:$0xff]  ;;  %v416_v63 = vld [vmem:[#allocation2 + $0x38] sm:$0xff]  ;;  %v414_v5 = vld [vmem:[#allocation2 + $0x28] sm:$0xff] }
  0x54   : > { %1390 = vmatpush3.bf16.msra.mxu0 %v1555_v19  ;;  %1453 = vmatpush3.bf16.msra.mxu1 %v1555_v19  ;;  %v424_v0 = vld [vmem:[#allocation2 + $0x78] sm:$0xff]  ;;  %v422_v6 = vld [vmem:[#allocation2 + $0x68] sm:$0xff]  ;;  %v687_v18 = vld [vmem:[%s1892_s21] sm:$0xff] (!%p1327_p6)  ;;  %v1724_v19 = vmov (!%p1327_p6), 0  }
  0x55   : > { %1391 = vmatprep.subr.bf16.mxu0 %v1556_v20  ;;  %1446 = vmatprep.subr.bf16.mxu1 %v1556_v20  ;;  %v688_v17 = vld [vmem:[%s1892_s21 + $0x8] sm:$0xff] (!%p1327_p6)  ;;  %v695_v21 = vld [vmem:[%s1892_s21 + $0x40] sm:$0xff] (!%p1327_p6)  ;;  %v697_v22 = vld [vmem:[%s1892_s21 + $0x50] sm:$0xff] (!%p1327_p6)  ;;  %vm815_vm3 = vcmp.gt.f32.partialorder (!%p1327_p6), %v687_v18, 0.0 }
  0x56   : > { %1570 = vset.pattern.permute.xlu1 (!%p1327_p6), %v1724_v19  ;;  %1569 = vset.pattern.permute.xlu0 (!%p1327_p6), %v1724_v19  ;;  %vm816_vm2 = vcmp.gt.f32.partialorder (!%p1327_p6), %v688_v17, 0.0  ;;  %vm823_vm11 = vcmp.gt.f32.partialorder (!%p1327_p6), %v695_v21, 0.0  ;;  %vm825_vm12 = vcmp.gt.f32.partialorder (!%p1327_p6), %v697_v22, 0.0 }
  0x57   : > { %726 = vperm.xlu1 (!%p1327_p6), %1570, %v688_v17   ;;  %721 = vperm.xlu0 (!%p1327_p6), %1569, %v687_v18  }
  0x58   : > { %1392 = vmatpush3.bf16.msra.mxu0 %v1556_v20  ;;  %1454 = vmatpush3.bf16.msra.mxu1 %v1556_v20  ;;  %v696_v20 = vld [vmem:[%s1892_s21 + $0x48] sm:$0xff] (!%p1327_p6) }
  0x59   : > { %1393 = vmatprep.subr.bf16.mxu0 %v1557_v23  ;;  %1447 = vmatprep.subr.bf16.mxu1 %v1557_v23  ;;  %vm824_vm10 = vcmp.gt.f32.partialorder (!%p1327_p6), %v696_v20, 0.0 }
  0x5b   : > { %766 = vperm.xlu1 (!%p1327_p6), %1570, %v696_v20   ;;  %761 = vperm.xlu0 (!%p1327_p6), %1569, %v695_v21  }
  0x5c   : > { %1394 = vmatpush3.bf16.msra.mxu0 %v1557_v23  ;;  %1455 = vmatpush3.bf16.msra.mxu1 %v1557_v23  ;;  %v689_v23 = vld [vmem:[%s1892_s21 + $0x10] sm:$0xff] (!%p1327_p6) }
  0x5d   : > { %1395 = vmatprep.subr.bf16.mxu0 %v1558_v24  ;;  %1448 = vmatprep.subr.bf16.mxu1 %v1558_v24  ;;  %vm817_vm4 = vcmp.gt.f32.partialorder (!%p1327_p6), %v689_v23, 0.0 }
  0x5f   : > { %771 = vperm.xlu1 (!%p1327_p6), %1570, %v697_v22   ;;  %731 = vperm.xlu0 (!%p1327_p6), %1569, %v689_v23  }
  0x60   : > { %1396 = vmatpush3.bf16.msra.mxu0 %v1558_v24  ;;  %1456 = vmatpush3.bf16.msra.mxu1 %v1558_v24  ;;  %v950_v24 = vld [vmem:[%s2100_s3] sm:$0xff] (!%p1327_p6) }
  0x61   : > { %1397 = vmatprep.subr.bf16.mxu0 %v1559_v25  ;;  %1449 = vmatprep.subr.bf16.mxu1 %v1559_v25 }
  0x64   : > { %1398 = vmatpush3.bf16.msra.mxu0 %v1559_v25  ;;  %1457 = vmatpush3.bf16.msra.mxu1 %v1559_v25  ;;  %v698_v25 = vld [vmem:[%s1892_s21 + $0x58] sm:$0xff] (!%p1327_p6) }
  0x65   : > { %1399 = vmatprep.subr.bf16.mxu0 %v1560_v26  ;;  %1450 = vmatprep.subr.bf16.mxu1 %v1560_v26  ;;  %vm826_vm13 = vcmp.gt.f32.partialorder (!%p1327_p6), %v698_v25, 0.0 }
  0x66   : > { %776 = vperm.xlu1 (!%p1327_p6), %1570, %v698_v25  }
  0x68   : > { %1400 = vmatpush3.bf16.msra.mxu0 %v1560_v26  ;;  %1458 = vmatpush3.bf16.msra.mxu1 %v1560_v26  ;;  %v690_v26 = vld [vmem:[%s1892_s21 + $0x18] sm:$0xff] (!%p1327_p6) }
  0x69   : > { %1417 = vmatprep.subr.mxu0 (!%p1327_p6), %v950_v24  ;;  %1459 = vmatprep.subr.mxu1 (!%p1327_p6), %v950_v24  ;;  %vm818_vm5 = vcmp.gt.f32.partialorder (!%p1327_p6), %v690_v26, 0.0 }
  0x6a   : > { %736 = vperm.xlu0 (!%p1327_p6), %1569, %v690_v26  }
  0x6b   : > { %1402 = vmatmul.mubr.bf16.vlgmr.msra.gmra.mrb[0].mxu0 %v1563_v27  ;;  %1410 = vmatmul.mubr.bf16.vlgmr.msra.gmra.mrb[0].mxu1 %v1564_v28  ;;  %v699_v27 = vld [vmem:[%s1892_s21 + $0x60] sm:$0xff] (!%p1327_p6) }
  0x6c   : > { %1405 = vmatprep.mubr.bf16.mxu0 %v1565_v29  ;;  %1413 = vmatprep.mubr.bf16.mxu1 %v1566_v30  ;;  %v691_v28 = vld [vmem:[%s1892_s21 + $0x20] sm:$0xff] (!%p1327_p6)  ;;  %v700_v29 = vld [vmem:[%s1892_s21 + $0x68] sm:$0xff] (!%p1327_p6)  ;;  %vm827_vm14 = vcmp.gt.f32.partialorder (!%p1327_p6), %v699_v27, 0.0 }
  0x6d   : > { %1418 = vmatpush3.msra.mxu0 (!%p1327_p6), %v950_v24  ;;  %1460 = vmatpush3.msra.mxu1 (!%p1327_p6), %v950_v24  ;;  %v692_v30 = vld [vmem:[%s1892_s21 + $0x28] sm:$0xff] (!%p1327_p6)  ;;  %vm819_vm6 = vcmp.gt.f32.partialorder (!%p1327_p6), %v691_v28, 0.0  ;;  %vm828_vm15 = vcmp.gt.f32.partialorder (!%p1327_p6), %v700_v29, 0.0 }
  0x6e   : > { %781 = vperm.xlu1 (!%p1327_p6), %1570, %v699_v27   ;;  %741 = vperm.xlu0 (!%p1327_p6), %1569, %v691_v28   ;;  %vm820_vm7 = vcmp.gt.f32.partialorder (!%p1327_p6), %v692_v30, 0.0 }
  0x72   : > { %786 = vperm.xlu1 (!%p1327_p6), %1570, %v700_v29   ;;  %746 = vperm.xlu0 (!%p1327_p6), %1569, %v692_v30  }
  0x73   : > { %1406 = vmatmul.mubr.bf16.gmra.mrb[4].mxu0 %v1567_v31  ;;  %1414 = vmatmul.mubr.bf16.gmra.mrb[4].mxu1 %v1568_v32  ;;  %v701_v31 = vld [vmem:[%s1892_s21 + $0x70] sm:$0xff] (!%p1327_p6) }
  0x74   : > { %v693_v32 = vld [vmem:[%s1892_s21 + $0x30] sm:$0xff] (!%p1327_p6)  ;;  %vm829_vm0 = vcmp.gt.f32.partialorder (!%p1327_p6), %v701_v31, 0.0 }
  0x75   : > { %vm821_vm8 = vcmp.gt.f32.partialorder (!%p1327_p6), %v693_v32, 0.0 }
  0x76   : > { %791 = vperm.xlu1 (!%p1327_p6), %1570, %v701_v31   ;;  %751 = vperm.xlu0 (!%p1327_p6), %1569, %v693_v32  }
 0x13e   : > { %v1403_v37 = vpop.f32.mrb[0].mxu0  ;;  %v1411_v38 = vpop.f32.mrb[0].mxu1 }
 0x13f   : > { %v652_v41 = vadd.f32 %v1403_v37, %v411_v33  ;;  %v660_v42 = vadd.f32 %v1411_v38, %v419_v34  ;;  %v587_v43 = vpop.f32.mrb[1].mxu0  ;;  %v619_v44 = vpop.f32.mrb[1].mxu1  ;;  %v1725_v33 = vmov (!%p1327_p6), 0.0   ;;  %v702_v38 = vld [vmem:[%s1892_s21 + $0x78] sm:$0xff] (!%p1327_p6) }
 0x140   : > { %v650_v47 = vadd.f32 %v587_v43, %v409_v35  ;;  %v658_v48 = vadd.f32 %v619_v44, %v417_v36  ;;  %v1404_v49 = vpop.f32.mrb[2].mxu0  ;;  %v1412_v50 = vpop.f32.mrb[2].mxu1  ;;  %v832_v34 = vsel (!%p1327_p6), %vm816_vm2, 1.0, %v1725_v33  ;;  %v831_v35 = vsel (!%p1327_p6), %vm815_vm3, 1.0, %v1725_v33  ;;  %796 = vperm.xlu1 (!%p1327_p6), %1570, %v702_v38  }
 0x141   : > { %669 = vst.msk [vmem:[#allocation2 + $0x10] sm:$0xff] %vm666_vm1, %v652_v41  ;;  %677 = vst.msk [vmem:[#allocation2 + $0x50] sm:$0xff] %vm666_vm1, %v660_v42  ;;  %v653_v51 = vadd.f32 %v1404_v49, %v412_v39  ;;  %v661_v52 = vadd.f32 %v1412_v50, %v420_v40  ;;  %v590_v53 = vpop.f32.mrb[3].mxu0  ;;  %v622_v54 = vpop.f32.mrb[3].mxu1  ;;  %v833_v36 = vsel (!%p1327_p6), %vm817_vm4, 1.0, %v1725_v33  ;;  %v834_v37 = vsel (!%p1327_p6), %vm818_vm5, 1.0, %v1725_v33 }
 0x142   : > { %667 = vst.msk [vmem:[#allocation2] sm:$0xff] %vm666_vm1, %v650_v47  ;;  %675 = vst.msk [vmem:[#allocation2 + $0x40] sm:$0xff] %vm666_vm1, %v658_v48  ;;  %v651_v55 = vadd.f32 %v590_v53, %v410_v45  ;;  %v659_v56 = vadd.f32 %v622_v54, %v418_v46  ;;  %v694_v39 = vld [vmem:[%s1892_s21 + $0x38] sm:$0xff] (!%p1327_p6)  ;;  %v1571_v40 = vpack.i.bf16 (!%p1327_p6), %v832_v34, %v831_v35  ;;  %v835_v42 = vsel (!%p1327_p6), %vm819_vm6, 1.0, %v1725_v33 }
 0x143   : > { %670 = vst.msk [vmem:[#allocation2 + $0x18] sm:$0xff] %vm666_vm1, %v653_v51  ;;  %678 = vst.msk [vmem:[#allocation2 + $0x58] sm:$0xff] %vm666_vm1, %v661_v52  ;;  %vm822_vm9 = vcmp.gt.f32.partialorder (!%p1327_p6), %v694_v39, 0.0  ;;  %756 = vperm.xlu0 (!%p1327_p6), %1569, %v694_v39   ;;  %v1576_v41 = vpack.i.bf16 (!%p1327_p6), %v834_v37, %v833_v36  ;;  %v836_v43 = vsel (!%p1327_p6), %vm820_vm7, 1.0, %v1725_v33  ;;  %v837_v44 = vsel (!%p1327_p6), %vm821_vm8, 1.0, %v1725_v33 }
 0x144   : > { %668 = vst.msk [vmem:[#allocation2 + $0x8] sm:$0xff] %vm666_vm1, %v651_v55  ;;  %676 = vst.msk [vmem:[#allocation2 + $0x48] sm:$0xff] %vm666_vm1, %v659_v56  ;;  %v838_v45 = vsel (!%p1327_p6), %vm822_vm9, 1.0, %v1725_v33  ;;  %v1581_v47 = vpack.i.bf16 (!%p1327_p6), %v836_v43, %v835_v42  ;;  %v840_v48 = vsel (!%p1327_p6), %vm824_vm10, 1.0, %v1725_v33  ;;  %v839_v49 = vsel (!%p1327_p6), %vm823_vm11, 1.0, %v1725_v33 }
 0x145   : > { %1577 = vperm.xlu1 (!%p1327_p6), %1570, %v1576_v41   ;;  %v1586_v46 = vpack.i.bf16 (!%p1327_p6), %v838_v45, %v837_v44  ;;  %v841_v50 = vsel (!%p1327_p6), %vm825_vm12, 1.0, %v1725_v33  ;;  %v842_v51 = vsel (!%p1327_p6), %vm826_vm13, 1.0, %v1725_v33  ;;  %vm830_vm2 = vcmp.gt.f32.partialorder (!%p1327_p6), %v702_v38, 0.0 }
 0x146   : > { %v1407_v61 = vpop.f32.mrb[4].mxu0  ;;  %v1415_v62 = vpop.f32.mrb[4].mxu1  ;;  %686 = sbr.rel (%p1327_p6) target bundleno = 671 (0x29f), region = 89  ;;  %v1596_v52 = vpack.i.bf16 (!%p1327_p6), %v842_v51, %v841_v50  ;;  %v1591_v53 = vpack.i.bf16 (!%p1327_p6), %v840_v48, %v839_v49  ;;  %v843_v54 = vsel (!%p1327_p6), %vm827_vm14, 1.0, %v1725_v33  ;;  %v844_v55 = vsel (!%p1327_p6), %vm828_vm15, 1.0, %v1725_v33 }
 0x147   : > { %v656_v1 = vadd.f32 %v1407_v61, %v415_v57  ;;  %v664_v2 = vadd.f32 %v1415_v62, %v423_v58  ;;  %v603_v3 = vpop.f32.mrb[5].mxu0  ;;  %v635_v4 = vpop.f32.mrb[5].mxu1  ;;  %1572 = vperm.xlu0 (!%p1327_p6), %1569, %v1571_v40   ;;  %v845_v56 = vsel (!%p1327_p6), %vm829_vm0, 1.0, %v1725_v33  ;;  %v846_v57 = vsel (!%p1327_p6), %vm830_vm2, 1.0, %v1725_v33  ;;  %v1988_v50 = vld [vmem:[%s2101_s4] ss:$0 sm:$0xff] (!%p1327_p6) }
 0x148   : > { %v654_v7 = vadd.f32 %v603_v3, %v413_v59  ;;  %v662_v8 = vadd.f32 %v635_v4, %v421_v60  ;;  %v1408_v9 = vpop.f32.mrb[6].mxu0  ;;  %v1416_v10 = vpop.f32.mrb[6].mxu1  ;;  %v1606_v58 = vpack.i.bf16 (!%p1327_p6), %v846_v57, %v845_v56  ;;  %v1601_v59 = vpack.i.bf16 (!%p1327_p6), %v844_v55, %v843_v54 }
 0x149   : > { %673 = vst.msk [vmem:[#allocation2 + $0x30] sm:$0xff] %vm666_vm1, %v656_v1  ;;  %681 = vst.msk [vmem:[#allocation2 + $0x70] sm:$0xff] %vm666_vm1, %v664_v2  ;;  %v657_v11 = vadd.f32 %v1408_v9, %v416_v63  ;;  %v665_v12 = vadd.f32 %v1416_v10, %v424_v0  ;;  %v606_v13 = vpop.f32.mrb[7].mxu0  ;;  %v638_v14 = vpop.f32.mrb[7].mxu1  ;;  %1587 = vperm.xlu1 (!%p1327_p6), %1570, %v1586_v46   ;;  %v703_v61 = vld [vmem:[#allocation2] sm:$0xff] (!%p1327_p6)  ;;  %v705_v9 = vld [vmem:[#allocation2 + $0x10] sm:$0xff] (!%p1327_p6) }
 0x14a   : > { %671 = vst.msk [vmem:[#allocation2 + $0x20] sm:$0xff] %vm666_vm1, %v654_v7  ;;  %679 = vst.msk [vmem:[#allocation2 + $0x60] sm:$0xff] %vm666_vm1, %v662_v8  ;;  %v655_v15 = vadd.f32 %v606_v13, %v414_v5  ;;  %v663_v16 = vadd.f32 %v638_v14, %v422_v6  ;;  %v727_v62 = vpop.permute.xlu1 (!%p1327_p6), %726  ;;  %v722_v63 = vpop.permute.xlu0 (!%p1327_p6), %721  ;;  %v711_v3 = vld [vmem:[#allocation2 + $0x40] sm:$0xff] (!%p1327_p6)  ;;  %v713_v8 = vld [vmem:[#allocation2 + $0x50] sm:$0xff] (!%p1327_p6) }
 0x14b   : > { %674 = vst.msk [vmem:[#allocation2 + $0x38] sm:$0xff] %vm666_vm1, %v657_v11  ;;  %682 = vst.msk [vmem:[#allocation2 + $0x78] sm:$0xff] %vm666_vm1, %v665_v12  ;;  %1582 = vperm.xlu0 (!%p1327_p6), %1569, %v1581_v47   ;;  %v704_v60 = vld [vmem:[#allocation2 + $0x8] sm:$0xff] (!%p1327_p6)  ;;  %v799_v1 = vmul.f32 (!%p1327_p6), %v722_v63, %v703_v61  ;;  %v714_v14 = vld [vmem:[#allocation2 + $0x58] sm:$0xff] (!%p1327_p6) }
 0x14c   : > { %672 = vst.msk [vmem:[#allocation2 + $0x28] sm:$0xff] %vm666_vm1, %v655_v15  ;;  %680 = vst.msk [vmem:[#allocation2 + $0x68] sm:$0xff] %vm666_vm1, %v663_v16  ;;  %v800_v0 = vmul.f32 (!%p1327_p6), %v727_v62, %v704_v60  ;;  %v712_v2 = vld [vmem:[#allocation2 + $0x48] sm:$0xff] (!%p1327_p6)  ;;  %v706_v15 = vld [vmem:[#allocation2 + $0x18] sm:$0xff] (!%p1327_p6) }
 0x14d   : > { %1597 = vperm.xlu1 %1570, %v1596_v52   ;;  %1419 = vmatprep.mubr.msk.f32.mxu0 %vm666_vm1, %v799_v1 }
 0x14e   : > { %v767_v4 = vpop.permute.xlu1 %766  ;;  %1420 = vmatmul.mubr.msk.f32.vlgmr.msra.gmra.mrb[0].mxu0 %vm666_vm1, %v800_v0  ;;  %v762_v5 = vpop.permute.xlu0 %761 }
 0x14f   : > { %1592 = vperm.xlu0 %1569, %v1591_v53   ;;  %v808_v6 = vmul.f32 %v767_v4, %v712_v2  ;;  %v807_v7 = vmul.f32 %v762_v5, %v711_v3 }
 0x150   : > { %v717_v32 = vld [vmem:[#allocation2 + $0x70] sm:$0xff] }
 0x151   : > { %1607 = vperm.xlu1 %1570, %v1606_v58   ;;  %1431 = vmatprep.mubr.msk.f32.mxu1 %vm666_vm1, %v807_v7  ;;  %v715_v20 = vld [vmem:[#allocation2 + $0x60] sm:$0xff]  ;;  %v709_v33 = vld [vmem:[#allocation2 + $0x30] sm:$0xff] }
 0x152   : > { %v772_v10 = vpop.permute.xlu1 %771  ;;  %1432 = vmatmul.mubr.msk.f32.vlgmr.msra.gmra.mrb[0].mxu1 %vm666_vm1, %v808_v6  ;;  %v732_v11 = vpop.permute.xlu0 %731  ;;  %v707_v21 = vld [vmem:[#allocation2 + $0x20] sm:$0xff]  ;;  %v718_v38 = vld [vmem:[#allocation2 + $0x78] sm:$0xff] }
 0x153   : > { %1602 = vperm.xlu0 %1569, %v1601_v59   ;;  %v809_v12 = vmul.f32 %v772_v10, %v713_v8  ;;  %v801_v13 = vmul.f32 %v732_v11, %v705_v9  ;;  %v716_v26 = vld [vmem:[#allocation2 + $0x68] sm:$0xff]  ;;  %v710_v39 = vld [vmem:[#allocation2 + $0x38] sm:$0xff] }
 0x154   : > { %v708_v27 = vld [vmem:[#allocation2 + $0x28] sm:$0xff] }
 0x155   : > { %1422 = vmatprep.mubr.msk.f32.mxu0 %vm666_vm1, %v801_v13  ;;  %1434 = vmatprep.mubr.msk.f32.mxu1 %vm666_vm1, %v809_v12 }
 0x156   : > { %v777_v16 = vpop.permute.xlu1 %776  ;;  %v737_v17 = vpop.permute.xlu0 %736 }
 0x157   : > { %v810_v18 = vmul.f32 %v777_v16, %v714_v14  ;;  %v802_v19 = vmul.f32 %v737_v17, %v706_v15 }
 0x159   : > { %1423 = vmatmul.mubr.msk.f32.gmra.mrb[2].mxu0 %vm666_vm1, %v802_v19  ;;  %1435 = vmatmul.mubr.msk.f32.gmra.mrb[2].mxu1 %vm666_vm1, %v810_v18 }
 0x15a   : > { %v782_v22 = vpop.permute.xlu1 %781  ;;  %v742_v23 = vpop.permute.xlu0 %741 }
 0x15b   : > { %v811_v24 = vmul.f32 %v782_v22, %v715_v20  ;;  %v803_v25 = vmul.f32 %v742_v23, %v707_v21 }
 0x15d   : > { %1425 = vmatprep.mubr.msk.f32.mxu0 %vm666_vm1, %v803_v25  ;;  %1437 = vmatprep.mubr.msk.f32.mxu1 %vm666_vm1, %v811_v24 }
 0x15e   : > { %v787_v28 = vpop.permute.xlu1 %786  ;;  %v747_v29 = vpop.permute.xlu0 %746 }
 0x15f   : > { %v812_v30 = vmul.f32 %v787_v28, %v716_v26  ;;  %v804_v31 = vmul.f32 %v747_v29, %v708_v27 }
 0x161   : > { %1426 = vmatmul.mubr.msk.f32.gmra.mrb[4].mxu0 %vm666_vm1, %v804_v31  ;;  %1438 = vmatmul.mubr.msk.f32.gmra.mrb[4].mxu1 %vm666_vm1, %v812_v30 }
 0x162   : > { %v792_v34 = vpop.permute.xlu1 %791  ;;  %v752_v35 = vpop.permute.xlu0 %751 }
 0x163   : > { %v813_v36 = vmul.f32 %v792_v34, %v717_v32  ;;  %v805_v37 = vmul.f32 %v752_v35, %v709_v33 }
 0x165   : > { %1428 = vmatprep.mubr.msk.f32.mxu0 %vm666_vm1, %v805_v37  ;;  %1440 = vmatprep.mubr.msk.f32.mxu1 %vm666_vm1, %v813_v36 }
 0x1bf   : > { %v797_v40 = vpop.permute.xlu1 %796 }
 0x1c0   : > { %v814_v42 = vmul.f32 %v797_v40, %v718_v38 }
 0x1c2   : > { %v757_v41 = vpop.permute.xlu0 %756  ;;  %1441 = vmatmul.mubr.msk.f32.gmra.mrb[6].mxu1 %vm666_vm1, %v814_v42 }
 0x1c3   : > { %v806_v43 = vmul.f32 %v757_v41, %v710_v39 }
 0x1c4   : > { %v1578_v46 = vpop.permute.xlu1 %1577 }
 0x1c5   : > { %1429 = vmatmul.mubr.msk.f32.gmra.mrb[6].mxu0 %vm666_vm1, %v806_v43  ;;  %v1580_v4 = vunpack.i.h.bf16 %v1578_v46  ;;  %v1579_v7 = vunpack.i.l.bf16 %v1578_v46 }
 0x1c6   : > { %v1573_v44 = vpop.permute.xlu0 %1572 }
 0x1c7   : > { %v1575_v47 = vunpack.i.h.bf16 %v1573_v44  ;;  %v1574_v48 = vunpack.i.l.bf16 %v1573_v44  ;;  %v937_v12 = vmul.f32 %v1580_v4, %v1988_v50  ;;  %v936_v16 = vmul.f32 %v1579_v7, %v1988_v50 }
 0x1c8   : > { %v1990_v51 = vpop.permute.xlu1 %1587 }
 0x1c9   : > { %v935_v53 = vmul.f32 %v1575_v47, %v1988_v50  ;;  %v934_v56 = vmul.f32 %v1574_v48, %v1988_v50 }
 0x1ca   : > { %v1983_v45 = vpop.permute.xlu0 %1582 }
 0x1cb   : > { %v1585_v24 = vunpack.i.h.bf16 %v1983_v45  ;;  %v1584_v28 = vunpack.i.l.bf16 %v1983_v45  ;;  %v1590_v45 = vunpack.i.h.bf16 %v1990_v51 }
 0x1cc   : > { %v1598_v60 = vpop.permute.xlu1 %1597 }
 0x1cd   : > { %v1600_v5 = vunpack.i.h.bf16 %v1598_v60  ;;  %v1599_v8 = vunpack.i.l.bf16 %v1598_v60  ;;  %v939_v33 = vmul.f32 %v1585_v24, %v1988_v50  ;;  %v938_v37 = vmul.f32 %v1584_v28, %v1988_v50 }
 0x1ce   : > { %v1593_v49 = vpop.permute.xlu0 %1592 }
 0x1cf   : > { %v1595_v52 = vunpack.i.h.bf16 %v1593_v49  ;;  %v1594_v54 = vunpack.i.l.bf16 %v1593_v49  ;;  %v945_v13 = vmul.f32 %v1600_v5, %v1988_v50  ;;  %v944_v17 = vmul.f32 %v1599_v8, %v1988_v50 }
 0x1d0   : > { %v1608_v32 = vpop.permute.xlu1 %1607  ;;  %v1589_v49 = vunpack.i.l.bf16 %v1990_v51 }
 0x1d1   : > { %v943_v62 = vmul.f32 %v1595_v52, %v1988_v50  ;;  %v942_v1 = vmul.f32 %v1594_v54, %v1988_v50  ;;  %v1610_v46 = vunpack.i.h.bf16 %v1608_v32  ;;  %v1609_v52 = vunpack.i.l.bf16 %v1608_v32 }
 0x1d2   : > { %v1603_v11 = vpop.permute.xlu0 %1602 }
 0x1d3   : > { %v1605_v25 = vunpack.i.h.bf16 %v1603_v11  ;;  %v1604_v29 = vunpack.i.l.bf16 %v1603_v11  ;;  %v948_v51 = vmul.f32 %v1609_v52, %v1988_v50 }
 0x1d5   : > { %v947_v34 = vmul.f32 %v1605_v25, %v1988_v50  ;;  %v946_v38 = vmul.f32 %v1604_v29, %v1988_v50 }
 0x221   : > { %v1421_v55 = vpop.f32.mrb[0].mxu0 }
 0x222   : > { %v1071_v57 = vadd.f32 %v1421_v55, %v935_v53  ;;  %v1065_v58 = vpop.f32.mrb[1].mxu0  ;;  %v941_v55 = vmul.f32 %v1590_v45, %v1988_v50 }
 0x223   : > { %v1066_v59 = vadd.f32 %v1065_v58, %v934_v56  ;;  %v949_v56 = vmul.f32 %v1610_v46, %v1988_v50 }
 0x224   : > { %v1145_v61 = vmax.f32 %v1071_v57, 0.0 }
 0x225   : > { %v1144_v63 = vmax.f32 %v1066_v59, 0.0  ;;  %v1433_v0 = vpop.f32.mrb[0].mxu1  ;;  %v940_v59 = vmul.f32 %v1589_v49, %v1988_v50 }
 0x226   : > { %1161 = vst [vmem:[%s1896_s9 + $0x8] sm:$0xff] %v1145_v61  ;;  %v1111_v2 = vadd.f32 %v1433_v0, %v943_v62  ;;  %v1105_v3 = vpop.f32.mrb[1].mxu1 }
 0x227   : > { %1160 = vst [vmem:[%s1896_s9] sm:$0xff] %v1144_v63  ;;  %v1106_v6 = vadd.f32 %v1105_v3, %v942_v1 }
 0x228   : > { %v1153_v9 = vmax.f32 %v1111_v2, 0.0 }
 0x229   : > { %v1152_v10 = vmax.f32 %v1106_v6, 0.0 }
 0x22a   : > { %1169 = vst [vmem:[%s1896_s9 + $0x48] sm:$0xff] %v1153_v9 }
 0x22b   : > { %1168 = vst [vmem:[%s1896_s9 + $0x40] sm:$0xff] %v1152_v10 }
 0x22c   : > { %v1424_v14 = vpop.f32.mrb[2].mxu0  ;;  %v1436_v15 = vpop.f32.mrb[2].mxu1 }
 0x22d   : > { %v1081_v18 = vadd.f32 %v1424_v14, %v937_v12  ;;  %v1121_v19 = vadd.f32 %v1436_v15, %v945_v13  ;;  %v1075_v20 = vpop.f32.mrb[3].mxu0  ;;  %v1115_v21 = vpop.f32.mrb[3].mxu1 }
 0x22e   : > { %v1076_v22 = vadd.f32 %v1075_v20, %v936_v16  ;;  %v1116_v23 = vadd.f32 %v1115_v21, %v944_v17 }
 0x22f   : > { %v1147_v26 = vmax.f32 %v1081_v18, 0.0  ;;  %v1155_v27 = vmax.f32 %v1121_v19, 0.0 }
 0x230   : > { %v1146_v30 = vmax.f32 %v1076_v22, 0.0  ;;  %v1154_v31 = vmax.f32 %v1116_v23, 0.0 }
 0x231   : > { %1163 = vst [vmem:[%s1896_s9 + $0x18] sm:$0xff] %v1147_v26  ;;  %1171 = vst [vmem:[%s1896_s9 + $0x58] sm:$0xff] %v1155_v27 }
 0x232   : > { %1162 = vst [vmem:[%s1896_s9 + $0x10] sm:$0xff] %v1146_v30  ;;  %1170 = vst [vmem:[%s1896_s9 + $0x50] sm:$0xff] %v1154_v31 }
 0x234   : > { %v1427_v35 = vpop.f32.mrb[4].mxu0  ;;  %v1439_v36 = vpop.f32.mrb[4].mxu1 }
 0x235   : > { %v1091_v39 = vadd.f32 %v1427_v35, %v939_v33  ;;  %v1131_v40 = vadd.f32 %v1439_v36, %v947_v34  ;;  %v1085_v41 = vpop.f32.mrb[5].mxu0  ;;  %v1125_v42 = vpop.f32.mrb[5].mxu1 }
 0x236   : > { %v1086_v43 = vadd.f32 %v1085_v41, %v938_v37  ;;  %v1126_v44 = vadd.f32 %v1125_v42, %v946_v38 }
 0x237   : > { %v1149_v47 = vmax.f32 %v1091_v39, 0.0  ;;  %v1157_v48 = vmax.f32 %v1131_v40, 0.0 }
 0x238   : > { %v1148_v53 = vmax.f32 %v1086_v43, 0.0  ;;  %v1156_v54 = vmax.f32 %v1126_v44, 0.0 }
 0x239   : > { %1165 = vst [vmem:[%s1896_s9 + $0x28] sm:$0xff] %v1149_v47  ;;  %1173 = vst [vmem:[%s1896_s9 + $0x68] sm:$0xff] %v1157_v48 }
 0x23a   : > { %1164 = vst [vmem:[%s1896_s9 + $0x20] sm:$0xff] %v1148_v53  ;;  %1172 = vst [vmem:[%s1896_s9 + $0x60] sm:$0xff] %v1156_v54 }
 0x295   : > { %v1442_v58 = vpop.f32.mrb[6].mxu1 }
 0x296   : > { %v1141_v61 = vadd.f32 %v1442_v58, %v949_v56  ;;  %v1135_v63 = vpop.f32.mrb[7].mxu1 }
 0x297   : > { %v1136_v1 = vadd.f32 %v1135_v63, %v948_v51 }
 0x298   : > { %v1430_v57 = vpop.f32.mrb[6].mxu0  ;;  %v1159_v3 = vmax.f32 %v1141_v61, 0.0 }
 0x299   : > { %v1101_v60 = vadd.f32 %v1430_v57, %v941_v55  ;;  %v1095_v62 = vpop.f32.mrb[7].mxu0  ;;  %v1158_v5 = vmax.f32 %v1136_v1, 0.0 }
 0x29a   : > { %v1096_v0 = vadd.f32 %v1095_v62, %v940_v59  ;;  %1175 = vst [vmem:[%s1896_s9 + $0x78] sm:$0xff] %v1159_v3 }
 0x29b   : > { %v1151_v2 = vmax.f32 %v1101_v60, 0.0  ;;  %1174 = vst [vmem:[%s1896_s9 + $0x70] sm:$0xff] %v1158_v5 }
 0x29c   : > { %v1150_v4 = vmax.f32 %v1096_v0, 0.0 }
 0x29d   : > { %1167 = vst [vmem:[%s1896_s9 + $0x38] sm:$0xff] %v1151_v2 }
 0x29e   : > { %1166 = vst [vmem:[%s1896_s9 + $0x30] sm:$0xff] %v1150_v4 }
 0x29f PF: > { %s1351_s17 = sshll.u32 %s1709_s24, 11  ;;  %s1190_s12 = sshll.u32 %s1896_s9, 4  ;;  %s2035_s12 = int_to_ptr.vmem [resolvable:$true] %s1190_s12 }
 0x2a0   : > { %s2032_s8 = scalar_lea.hbm %s2102_s5, %s1351_s17  ;;  %s2115_s13 = sand.u32 1, %s1689_s19  }
 0x2a1   : > { %s2039_s10 = scalar_lea.sflag [#allocation5], %s2115_s13  ;;  %s1611_s7 = scalar_lea.vmem %s2035_s12, 2048 }
 0x2a2   : > { %p1612_p8 = scmp.ne.s32.totalorder %s2035_s12, %s1611_s7  ;;  %s1726_s24 = smov [#allocation4]  }
 0x2a3   : > { %s1615_s21 = sshll.u32 %s1726_s24, 4  ;;  %s1616_s21 = int_to_ptr.vmem [resolvable:$false] %s1615_s21 }
 0x2a4   : > { %p1613_p9 = pnand %p1612_p8, %p1831_p7  ;;  %s1617_s6 = scalar_lea.vmem %s1616_s21, 4096 }
 0x2a5   : > { %p1618_p11 = scmp.lt.s32.totalorder %s2035_s12, %s1616_s21  ;;  %p1619_p13 = scmp.lt.s32.totalorder %s1617_s6, %s1611_s7 }
 0x2a6   : > { %p1614_p10 = pneg %p1613_p9 }
 0x2a7   : > { %p1620_p0 = por %p1619_p13, %p1618_p11 }
 0x2a9   : > { %p1621_p1 = pnand %p1620_p0, %p1614_p10 }
 0x2ab   : > { %1624 = shalt.err (!%p1621_p1)
}
 0x2ac   : > { %s1625_s9 = scalar_lea.hbm %s2032_s8, 2048  ;;  %s1629_s26 = scalar_lea.hbm %s2102_s5, 4096 }
 0x2ad   : > { %p1626_p2 = scmp.ne.s32.totalorder %s2032_s8, %s1625_s9  ;;  %p1630_p5 = scmp.lt.u32.totalorder %s2032_s8, %s2102_s5 }
 0x2ae   : > { %p1631_p6 = scmp.lt.u32.totalorder %s1629_s26, %s1625_s9  ;;  %p1633_p9 = scmp.lt.u32.totalorder %s1625_s9, %s2032_s8 }
 0x2af   : > { %p1627_p3 = pnand %p1626_p2, %p1831_p7 }
 0x2b0   : > { %p1632_p8 = por %p1631_p6, %p1630_p5 }
 0x2b1   : > { %p1628_p4 = pneg %p1627_p3 }
 0x2b2   : > { %p1634_p10 = por %p1633_p9, %p1632_p8 }
 0x2b4   : > { %p1635_p11 = pnand %p1634_p10, %p1628_p4 }
 0x2b6   : > { %1638 = shalt.err (!%p1635_p11)
}
 0x2b7   : > { %s1727_s28 = smov 128   ;;  %s1728_s29 = smov 8  }
 0x2b8   : > { %1461 = dma.vmem_to_hbm [thread:$0]  (%p1831_p7), %s2035_s12, 2048, %s2032_s8, %s2039_s10, %s1727_s28, %s1727_s28, %s1728_s29  }
 0x2b9 PF: > { %p1467_p13 = scmp.ge.s32.totalorder %s1721_s27, 2  ;;  %s1205_s13 = sand.u32 1, %s1685_s18  }
 0x2ba   : > { %s1206_s7 = scalar_lea.sflag [#allocation5], %s1205_s13 }
 0x2bb   : > { %p1464_p0 = pnand %p1467_p13, %p1839_p12 }
 0x2bd   : > { %1680 = dma.done.wait (!%p1464_p0), %s1206_s7, 2048  }
 0x2be   : > { %1682 = vsyncadd (!%p1464_p0), %s1206_s7, 4294965248  ;;  %s18_s27 = sadd.s32 1, %s1721_s27   ;;  %s2116_s24 = sld [smem:[#allocation7_spill]] }
 0x2bf   : > { %p15_p1 = scmp.ge.s32.totalorder %s18_s27, 6   ;;  %s2117_s11 = sld [smem:[#allocation8_spill]] }
 0x2c0   : > { %s2118_s26 = sld [smem:[#allocation9_spill]]  ;;  %s2119_s18 = smov %s1689_s19 }
 0x2c1   : > { %s2120_s19 = smov %s1693_s20  ;;  %s2121_s20 = smov %s1844_s15 }
 0x2c2   : > { %s2122_s21 = smov %s1701_s22  ;;  %s2123_s22 = smov %s1847_s16 }
 0x2c3   : > { %s2124_s23 = smov %s1713_s25  ;;  %17 = sbr.rel (!%p15_p1) target bundleno = 8 (0x8), region = 135 }
 0x2c5   : > { %s2125_s25 = smov %s2117_s11 }
 0x2ca   :  { %1211 = vsyncpa [#allocation5], 1 }
 0x2cb   :  { %1213 = vsyncpa [#allocation5 + $0x1], 1 }

</bundles_post_ra>
